<compile_context>
chip_gen: v7x
topology: tpu7x:2x2x1
jax: 0.10.0
libtpu: 0.0.40
codegen_flags: <defaults>
</compile_context>

<pallas_src>
import functools

import jax
import jax.numpy as jnp
from jax import lax
from jax.experimental import pallas as pl
from jax.experimental.pallas import tpu as pltpu

LANES = 128  # TPU lane width; all node/edge feature slabs are padded to this.


def _round_up(x, m):
    return ((x + m - 1) // m) * m


# ----------------------------------------------------------------------------
# Kernel 1: per-node projection, attention scores, skip projection.
# ----------------------------------------------------------------------------
def _node_kernel(x_ref, wp_ref, asrc_ref, atrg_ref, *rest, add_skip):
    if add_skip:
        wskip_ref = rest[0]
        proj_ref, ssrc_ref, strg_ref, skip_ref = rest[1:]
    else:
        proj_ref, ssrc_ref, strg_ref = rest

    x = x_ref[...]
    proj = jnp.dot(x, wp_ref[...], preferred_element_type=jnp.float32)
    proj_ref[...] = proj
    # Block-diagonal scoring matrices keep scoring on the MXU (lane-dense)
    # instead of a (TN, H, F) reshape + cross-lane (XLU) reduction.
    ssrc_ref[...] = jnp.dot(proj, asrc_ref[...], preferred_element_type=jnp.float32)
    strg_ref[...] = jnp.dot(proj, atrg_ref[...], preferred_element_type=jnp.float32)
    if add_skip:
        skip_ref[...] = jnp.dot(x, wskip_ref[...], preferred_element_type=jnp.float32)


# ----------------------------------------------------------------------------
# Kernel 2: edge-tiled 3-phase softmax + aggregation (index-driven gathers).
# ----------------------------------------------------------------------------
def _edge_kernel(src_ref, trg_ref,                      # scalar-prefetch (SMEM)
                 ssrc_ref, strg_ref, proj_ref, expand_ref, bias_ref,
                 *rest, TE, E, H, add_skip, concat):
    rest = list(rest)
    skip_ref = rest.pop(0) if add_skip else None
    finmat_ref = rest.pop(0) if not concat else None
    out_ref, ebuf, fbuf, dbuf, denom, gmax = rest

    phase = pl.program_id(0)
    t = pl.program_id(1)
    n_tiles = pl.num_programs(1)
    base = pl.multiple_of(t * TE, TE)
    neg = jnp.float32(-3.4e38)

    # ---- one-time init of persistent accumulators --------------------------
    @pl.when((phase == 0) & (t == 0))
    def _init():
        gmax[0, 0] = neg
        denom[...] = jnp.zeros_like(denom)
        out_ref[...] = jnp.zeros_like(out_ref)

    # ---- phase 0: gather + LeakyReLU edge scores once, exact global max ----
    @pl.when(phase == 0)
    def _phase_score_max():
        def gather(i, carry):
            s = src_ref[base + i]
            d = trg_ref[base + i]
            ebuf[pl.ds(base + i, 1), :] = (ssrc_ref[pl.ds(s, 1), :]
                                           + strg_ref[pl.ds(d, 1), :])
            return carry
        lax.fori_loop(0, TE, gather, 0)

        lane = lax.broadcasted_iota(jnp.int32, (TE, LANES), 1)
        row = lax.broadcasted_iota(jnp.int32, (TE, LANES), 0)
        valid = (lane < H) & ((base + row) < E)
        e = ebuf[pl.ds(base, TE), :]
        e = jnp.where(e > 0, e, 0.2 * e)                 # LeakyReLU(0.2)
        e = jnp.where(valid, e, neg)                     # mask pad edges/lanes
        ebuf[pl.ds(base, TE), :] = e
        gmax[0, 0] = jnp.maximum(gmax[0, 0], jnp.max(e))

    # ---- phase 1: exp (stored in-place) + scatter-add softmax denominators --
    @pl.when(phase == 1)
    def _phase_denom():
        # masked entries are ~ -3.4e38, so exp underflows to exactly 0.
        p = jnp.exp(ebuf[pl.ds(base, TE), :] - gmax[0, 0])
        ebuf[pl.ds(base, TE), :] = p

        def scatter(i, carry):
            d = trg_ref[base + i]
            denom[pl.ds(d, 1), :] = (denom[pl.ds(d, 1), :]
                                     + ebuf[pl.ds(base + i, 1), :])
            return carry
        lax.fori_loop(0, TE, scatter, 0)

    # ---- phase 2: attention weights, aggregate, finalize --------------------
    @pl.when(phase == 2)
    def _phase_aggregate():
        def gather(i, carry):
            s = src_ref[base + i]
            d = trg_ref[base + i]
            fbuf[pl.ds(i, 1), :] = proj_ref[pl.ds(s, 1), :]
            dbuf[pl.ds(i, 1), :] = denom[pl.ds(d, 1), :]
            return carry
        lax.fori_loop(0, TE, gather, 0)

        attn = ebuf[pl.ds(base, TE), :] / (dbuf[...] + jnp.float32(1e-16))
        # head -> feature-lane expansion as a 0/1 MXU matmul (no (E,H,F) reshape)
        attn_f = jnp.dot(attn, expand_ref[...], preferred_element_type=jnp.float32)
        fbuf[...] = attn_f * fbuf[...]                   # stage weighted features

        def scatter(i, carry):
            d = trg_ref[base + i]
            out_ref[pl.ds(d, 1), :] = (out_ref[pl.ds(d, 1), :]
                                       + fbuf[pl.ds(i, 1), :])
            return carry
        lax.fori_loop(0, TE, scatter, 0)

        @pl.when(t == n_tiles - 1)
        def _finalize():
            res = out_ref[...]
            if add_skip:
                res = res + skip_ref[...]
            if not concat:
                # mean over heads as an MXU matmul with a (HF, F)/H matrix
                res = jnp.dot(res, finmat_ref[...],
                              preferred_element_type=jnp.float32)
            res = res + bias_ref[...]
            out_ref[...] = jnp.where(res > 0, res,
                                     jnp.exp(jnp.minimum(res, 0.0)) - 1.0)


# ----------------------------------------------------------------------------
# Wrapper: padding, lane-dense parameter slabs, pallas_call plumbing.
# ----------------------------------------------------------------------------
def gat_layer_forward(x, edge_index, params, *, num_heads, num_out_features,
                      concat=True, add_skip=True,
                      node_tile=128, edge_tile=256):
    N, f_in = x.shape
    H, F = num_heads, num_out_features
    HF = H * F
    assert HF <= LANES and H <= LANES, "kernel packs H*F into one 128-lane vreg"
    out_dim = HF if concat else F
    E = edge_index.shape[1]
    f32 = jnp.float32

    # ----- padded sizes ------------------------------------------------------
    TN = min(node_tile, _round_up(N, 8))
    Np = _round_up(N, TN)
    TE = _round_up(min(edge_tile, _round_up(E, 8)), 8)
    Ep = _round_up(E, TE)
    n_edge_tiles = Ep // TE

    xp = jnp.zeros((Np, f_in), f32).at[:N, :].set(x.astype(f32))

    # ----- lane-dense (128-wide) parameter slabs ------------------------------
    wp_pad = jnp.zeros((f_in, LANES), f32).at[:, :HF].set(params['w_proj'])

    rows = jnp.arange(HF)
    heads = rows // F
    feats = rows % F
    asrc_bd = jnp.zeros((LANES, LANES), f32).at[rows, heads].set(
        params['a_src'].reshape(-1))
    atrg_bd = jnp.zeros((LANES, LANES), f32).at[rows, heads].set(
        params['a_trg'].reshape(-1))
    expand = jnp.zeros((LANES, LANES), f32).at[heads, rows].set(1.0)
    bias_pad = jnp.zeros((1, LANES), f32).at[0, :out_dim].set(params['bias'])

    node_inputs = [xp, wp_pad, asrc_bd, atrg_bd]
    if add_skip:
        if F != f_in:
            wskip_eff = jnp.zeros((f_in, LANES), f32).at[:, :HF].set(params['w_skip'])
        else:
            # F_out == F_in: skip is x broadcast across heads -> block-repeated
            # identity, so the skip becomes one fused MXU matmul (no jnp.tile).
            jidx = jnp.tile(jnp.arange(f_in), H)
            hidx = jnp.repeat(jnp.arange(H), f_in)
            wskip_eff = jnp.zeros((f_in, LANES), f32).at[jidx, hidx * F + jidx].set(1.0)
        node_inputs.append(wskip_eff)

    # ----- Kernel 1: node-tiled projection / scoring / skip -------------------
    n_node_out = 4 if add_skip else 3
    node_in_specs = [
        pl.BlockSpec((TN, f_in), lambda i: (i, 0)),
        pl.BlockSpec((f_in, LANES), lambda i: (0, 0)),
        pl.BlockSpec((LANES, LANES), lambda i: (0, 0)),
        pl.BlockSpec((LANES, LANES), lambda i: (0, 0)),
    ]
    if add_skip:
        node_in_specs.append(pl.BlockSpec((f_in, LANES), lambda i: (0, 0)))

    node_out = pl.pallas_call(
        functools.partial(_node_kernel, add_skip=add_skip),
        out_shape=tuple(jax.ShapeDtypeStruct((Np, LANES), f32)
                        for _ in range(n_node_out)),
        grid_spec=pltpu.PrefetchScalarGridSpec(
            num_scalar_prefetch=0,
            grid=(Np // TN,),
            in_specs=node_in_specs,
            out_specs=[pl.BlockSpec((TN, LANES), lambda i: (i, 0))
                       for _ in range(n_node_out)],
        ),
        compiler_params=pltpu.CompilerParams(
            dimension_semantics=("parallel",)),   # megacore-shard node tiles (v7x)
    )(*node_inputs)

    if add_skip:
        proj, s_src, s_trg, skip_init = node_out
    else:
        proj, s_src, s_trg = node_out
        skip_init = None

    # ----- Kernel 2: edge-tiled 3-phase softmax + aggregation ----------------
    src = jnp.zeros((Ep,), jnp.int32).at[:E].set(edge_index[0].astype(jnp.int32))
    trg = jnp.zeros((Ep,), jnp.int32).at[:E].set(edge_index[1].astype(jnp.int32))

    def _full(shape):
        return pl.BlockSpec(shape, lambda p, t, s, d: (0, 0))

    edge_inputs = [s_src, s_trg, proj, expand, bias_pad]
    edge_in_specs = [_full((Np, LANES)), _full((Np, LANES)), _full((Np, LANES)),
                     _full((LANES, LANES)), _full((1, LANES))]
    if add_skip:
        edge_inputs.append(skip_init)
        edge_in_specs.append(_full((Np, LANES)))
    if not concat:
        finmat = jnp.zeros((LANES, LANES), f32).at[rows, feats].set(1.0 / H)
        edge_inputs.append(finmat)
        edge_in_specs.append(_full((LANES, LANES)))

    scratch = [
        pltpu.VMEM((Ep, LANES), f32),   # ebuf  : per-edge scores, then exp(scores)
        pltpu.VMEM((TE, LANES), f32),   # fbuf  : gathered proj[src] / weighted feats
        pltpu.VMEM((TE, LANES), f32),   # dbuf  : gathered denom[trg]
        pltpu.VMEM((Np, LANES), f32),   # denom : per-node softmax denominators
        pltpu.SMEM((1, 1), f32),        # gmax  : global max of edge scores
    ]

    vmem_bytes = sum(2 * int(a.size) * 4 for a in edge_inputs)  # (double-buffered) inputs
    vmem_bytes += 2 * Np * LANES * 4                            # output accumulator
    vmem_bytes += (Ep + Np + 2 * TE) * LANES * 4                # VMEM scratch
    vmem_limit = int(min(vmem_bytes + (8 << 20), 64 * 1024 * 1024))  # v7x-safe cap

    out_pad = pl.pallas_call(
        functools.partial(_edge_kernel, TE=TE, E=E, H=H,
                          add_skip=add_skip, concat=concat),
        out_shape=jax.ShapeDtypeStruct((Np, LANES), f32),
        grid_spec=pltpu.PrefetchScalarGridSpec(
            num_scalar_prefetch=2,
            grid=(3, n_edge_tiles),
            in_specs=edge_in_specs,
            out_specs=_full((Np, LANES)),
            scratch_shapes=scratch,
        ),
        compiler_params=pltpu.CompilerParams(
            dimension_semantics=("arbitrary", "arbitrary"),
            vmem_limit_bytes=vmem_limit),
    )(src, trg, *edge_inputs)

    out = out_pad[:N, :out_dim]
    return out, edge_index


# ----------------------------------------------------------------------------
# Deterministic parameter init (Xavier/Glorot uniform, as in reset_parameter)
# ----------------------------------------------------------------------------
def _xavier_uniform(key, shape, fan_in, fan_out):
    limit = (6.0 / (fan_in + fan_out)) ** 0.5
    return jax.random.uniform(key, shape, jnp.float32, -limit, limit)


def init_params(key, f_in, H, F, concat=True):
    k1, k2, k3, k4 = jax.random.split(key, 4)
    out_dim = H * F if concat else F
    return {
        # stored already transposed: x @ w_proj == Linear(x)
        'w_proj': _xavier_uniform(k1, (f_in, H * F), f_in, H * F),
        'a_src': _xavier_uniform(k2, (H, F), H * F, F),
        'a_trg': _xavier_uniform(k3, (H, F), H * F, F),
        'w_skip': _xavier_uniform(k4, (f_in, H * F), f_in, H * F),
        'bias': jnp.zeros((out_dim,), jnp.float32),
    }


# ----------------------------------------------------------------------------
# Pure-JAX reference (mirrors the PyTorch forward, eval-mode dropout)
# ----------------------------------------------------------------------------
def gat_reference(x, edge_index, params, *, num_heads, num_out_features,
                  concat=True, add_skip=True):
    N, f_in = x.shape
    H, F = num_heads, num_out_features
    src, trg = edge_index[0], edge_index[1]

    proj = (x @ params['w_proj']).reshape(N, H, F)
    s_src = jnp.sum(proj * params['a_src'][None], axis=-1)
    s_trg = jnp.sum(proj * params['a_trg'][None], axis=-1)

    e = s_src[src] + s_trg[trg]
    e = jnp.where(e > 0, e, 0.2 * e)
    e = e - jnp.max(e)
    ex = jnp.exp(e)
    denom = jax.ops.segment_sum(ex, trg, num_segments=N)[trg]
    attn = ex / (denom + 1e-16)

    weighted = proj[src] * attn[:, :, None]
    out = jax.ops.segment_sum(weighted, trg, num_segments=N)

    if add_skip:
        if F == f_in:
            out = out + x[:, None, :]
        else:
            out = out + (x @ params['w_skip']).reshape(N, H, F)
    out = out.reshape(N, H * F) if concat else out.mean(axis=1)
    out = out + params['bias']
    return jnp.where(out > 0, out, jnp.exp(jnp.minimum(out, 0.0)) - 1.0)


# ----------------------------------------------------------------------------
if __name__ == "__main__":
    N, F_IN, H, F_OUT, E = 8, 16, 4, 8, 16

    key = jax.random.PRNGKey(0)
    kx, ke, kp = jax.random.split(key, 3)

    x = jax.random.normal(kx, (N, F_IN), jnp.float32)
    edge_index = jax.random.randint(ke, (2, E), 0, N, jnp.int32)
    params = init_params(kp, F_IN, H, F_OUT, concat=True)

    out, _ = gat_layer_forward(x, edge_index, params,
                               num_heads=H, num_out_features=F_OUT,
                               concat=True, add_skip=True,
                               edge_tile=8)   # 2 edge tiles: exercises accumulation
    out = jax.block_until_ready(out)

    ref = gat_reference(x, edge_index, params,
                        num_heads=H, num_out_features=F_OUT,
                        concat=True, add_skip=True)
    assert out.shape == (N, H * F_OUT)
    assert jnp.allclose(out, ref, atol=2e-3, rtol=2e-3), \
        f"max abs diff {jnp.max(jnp.abs(out - ref))}"

    print("KERNEL_OK")
</pallas_src>

<mosaic_0001>
module attributes {stable_mosaic.version = 11 : i64} {
  func.func @_node_kernel(%arg0: i32, %arg1: memref<8x16xf32, #tpu.memory_space<vmem>>, %arg2: memref<16x128xf32, #tpu.memory_space<vmem>>, %arg3: memref<128x128xf32, #tpu.memory_space<vmem>>, %arg4: memref<128x128xf32, #tpu.memory_space<vmem>>, %arg5: memref<16x128xf32, #tpu.memory_space<vmem>>, %arg6: memref<8x128xf32, #tpu.memory_space<vmem>>, %arg7: memref<8x128xf32, #tpu.memory_space<vmem>>, %arg8: memref<8x128xf32, #tpu.memory_space<vmem>>, %arg9: memref<8x128xf32, #tpu.memory_space<vmem>>) attributes {dimension_semantics = [#tpu.dimension_semantics<parallel>], iteration_bounds = array<i64: 1>, scalar_prefetch = 0 : i64, scratch_operands = 0 : i64, tpu.core_type = #tpu.core_type<tc>, window_params = [{transform_indices = @transform_0, window_bounds = array<i64: 8, 16>}, {pipeline_mode = #tpu.pipeline_mode<synchronous>, transform_indices = @transform_1, window_bounds = array<i64: 16, 128>}, {pipeline_mode = #tpu.pipeline_mode<synchronous>, transform_indices = @transform_2, window_bounds = array<i64: 128, 128>}, {pipeline_mode = #tpu.pipeline_mode<synchronous>, transform_indices = @transform_3, window_bounds = array<i64: 128, 128>}, {pipeline_mode = #tpu.pipeline_mode<synchronous>, transform_indices = @transform_4, window_bounds = array<i64: 16, 128>}, {transform_indices = @transform_5, window_bounds = array<i64: 8, 128>}, {transform_indices = @transform_6, window_bounds = array<i64: 8, 128>}, {transform_indices = @transform_7, window_bounds = array<i64: 8, 128>}, {transform_indices = @transform_8, window_bounds = array<i64: 8, 128>}]} {
    %c0 = arith.constant 0 : index
    %c0_0 = arith.constant 0 : index
    %0 = vector.load %arg1[%c0, %c0_0] : memref<8x16xf32, #tpu.memory_space<vmem>>, vector<8x16xf32>
    %c0_1 = arith.constant 0 : index
    %c0_2 = arith.constant 0 : index
    %1 = vector.load %arg2[%c0_1, %c0_2] : memref<16x128xf32, #tpu.memory_space<vmem>>, vector<16x128xf32>
    %cst = arith.constant dense<0.000000e+00> : vector<8x128xf32>
    %2 = tpu.matmul %0, %1, %cst {dimension_numbers = #tpu.dot_dimension_numbers<[1], [0], [0], [1], [0, 0, 1, 1], [], []>} : vector<8x16xf32>, vector<16x128xf32>, vector<8x128xf32> -> vector<8x128xf32>
    %c0_3 = arith.constant 0 : index
    %c0_4 = arith.constant 0 : index
    %3 = vector.load %arg6[%c0_3, %c0_4] : memref<8x128xf32, #tpu.memory_space<vmem>>, vector<8x128xf32>
    tpu.vector_store %arg6[%c0_3, %c0_4], %2 {strides = array<i32>} : memref<8x128xf32, #tpu.memory_space<vmem>>, vector<8x128xf32>,
    %c0_5 = arith.constant 0 : index
    %c0_6 = arith.constant 0 : index
    %4 = vector.load %arg3[%c0_5, %c0_6] : memref<128x128xf32, #tpu.memory_space<vmem>>, vector<128x128xf32>
    %cst_7 = arith.constant dense<0.000000e+00> : vector<8x128xf32>
    %5 = tpu.matmul %2, %4, %cst_7 {dimension_numbers = #tpu.dot_dimension_numbers<[1], [0], [0], [1], [0, 0, 1, 1], [], []>} : vector<8x128xf32>, vector<128x128xf32>, vector<8x128xf32> -> vector<8x128xf32>
    %c0_8 = arith.constant 0 : index
    %c0_9 = arith.constant 0 : index
    %6 = vector.load %arg7[%c0_8, %c0_9] : memref<8x128xf32, #tpu.memory_space<vmem>>, vector<8x128xf32>
    tpu.vector_store %arg7[%c0_8, %c0_9], %5 {strides = array<i32>} : memref<8x128xf32, #tpu.memory_space<vmem>>, vector<8x128xf32>,
    %c0_10 = arith.constant 0 : index
    %c0_11 = arith.constant 0 : index
    %7 = vector.load %arg4[%c0_10, %c0_11] : memref<128x128xf32, #tpu.memory_space<vmem>>, vector<128x128xf32>
    %cst_12 = arith.constant dense<0.000000e+00> : vector<8x128xf32>
    %8 = tpu.matmul %2, %7, %cst_12 {dimension_numbers = #tpu.dot_dimension_numbers<[1], [0], [0], [1], [0, 0, 1, 1], [], []>} : vector<8x128xf32>, vector<128x128xf32>, vector<8x128xf32> -> vector<8x128xf32>
    %c0_13 = arith.constant 0 : index
    %c0_14 = arith.constant 0 : index
    %9 = vector.load %arg8[%c0_13, %c0_14] : memref<8x128xf32, #tpu.memory_space<vmem>>, vector<8x128xf32>
    tpu.vector_store %arg8[%c0_13, %c0_14], %8 {strides = array<i32>} : memref<8x128xf32, #tpu.memory_space<vmem>>, vector<8x128xf32>,
    %c0_15 = arith.constant 0 : index
    %c0_16 = arith.constant 0 : index
    %10 = vector.load %arg5[%c0_15, %c0_16] : memref<16x128xf32, #tpu.memory_space<vmem>>, vector<16x128xf32>
    %cst_17 = arith.constant dense<0.000000e+00> : vector<8x128xf32>
    %11 = tpu.matmul %0, %10, %cst_17 {dimension_numbers = #tpu.dot_dimension_numbers<[1], [0], [0], [1], [0, 0, 1, 1], [], []>} : vector<8x16xf32>, vector<16x128xf32>, vector<8x128xf32> -> vector<8x128xf32>
    %c0_18 = arith.constant 0 : index
    %c0_19 = arith.constant 0 : index
    %12 = vector.load %arg9[%c0_18, %c0_19] : memref<8x128xf32, #tpu.memory_space<vmem>>, vector<8x128xf32>
    tpu.vector_store %arg9[%c0_18, %c0_19], %11 {strides = array<i32>} : memref<8x128xf32, #tpu.memory_space<vmem>>, vector<8x128xf32>,
    return
  }
  func.func @transform_0(%arg0: i32) -> (i32, i32) {
    %c0_i32 = arith.constant 0 : i32
    %c0_i32_0 = arith.constant 0 : i32
    return %arg0, %c0_i32 : i32, i32
  }
  func.func @transform_1(%arg0: i32) -> (i32, i32) {
    %c0_i32 = arith.constant 0 : i32
    %c0_i32_0 = arith.constant 0 : i32
    %c0_i32_1 = arith.constant 0 : i32
    return %c0_i32, %c0_i32_0 : i32, i32
  }
  func.func @transform_2(%arg0: i32) -> (i32, i32) {
    %c0_i32 = arith.constant 0 : i32
    %c0_i32_0 = arith.constant 0 : i32
    %c0_i32_1 = arith.constant 0 : i32
    return %c0_i32, %c0_i32_0 : i32, i32
  }
  func.func @transform_3(%arg0: i32) -> (i32, i32) {
    %c0_i32 = arith.constant 0 : i32
    %c0_i32_0 = arith.constant 0 : i32
    %c0_i32_1 = arith.constant 0 : i32
    return %c0_i32, %c0_i32_0 : i32, i32
  }
  func.func @transform_4(%arg0: i32) -> (i32, i32) {
    %c0_i32 = arith.constant 0 : i32
    %c0_i32_0 = arith.constant 0 : i32
    %c0_i32_1 = arith.constant 0 : i32
    return %c0_i32, %c0_i32_0 : i32, i32
  }
  func.func @transform_5(%arg0: i32) -> (i32, i32) {
    %c0_i32 = arith.constant 0 : i32
    %c0_i32_0 = arith.constant 0 : i32
    return %arg0, %c0_i32 : i32, i32
  }
  func.func @transform_6(%arg0: i32) -> (i32, i32) {
    %c0_i32 = arith.constant 0 : i32
    %c0_i32_0 = arith.constant 0 : i32
    return %arg0, %c0_i32 : i32, i32
  }
  func.func @transform_7(%arg0: i32) -> (i32, i32) {
    %c0_i32 = arith.constant 0 : i32
    %c0_i32_0 = arith.constant 0 : i32
    return %arg0, %c0_i32 : i32, i32
  }
  func.func @transform_8(%arg0: i32) -> (i32, i32) {
    %c0_i32 = arith.constant 0 : i32
    %c0_i32_0 = arith.constant 0 : i32
    return %arg0, %c0_i32 : i32, i32
  }
}

</mosaic_0001>

<bundles_post_ra>
// kernel: tpu_custom_call.1
= control target key start
LH: loop header
LB: loop body
LE: loop exit
PB: predicated region body
PF: predicated region fallthrough
CT: control target
= control target key end

     0   :  { %14 = vsyncpa [#allocation3], 0  ;;  %s1105_s0 = inlined_call_operand.hbm [shape: f32[8,16], index: 0, kind: input, shape index: {}]   ;;  %s1106_s1 = inlined_call_operand.hbm [shape: f32[16,128], index: 1, kind: input, shape index: {}]   ;;  %s1107_s2 = inlined_call_operand.hbm [shape: f32[128,128], index: 2, kind: input, shape index: {}]   ;;  %s1108_s3 = inlined_call_operand.hbm [shape: f32[128,128], index: 3, kind: input, shape index: {}]   ;;  %s1109_s4 = inlined_call_operand.hbm [shape: f32[16,128], index: 4, kind: input, shape index: {}]   ;;  %s1110_s5 = inlined_call_operand.hbm [shape: f32[8,128], index: 5, kind: output, shape index: {0}]   ;;  %s1111_s6 = inlined_call_operand.hbm [shape: f32[8,128], index: 6, kind: output, shape index: {1}]   ;;  %s1112_s7 = inlined_call_operand.hbm [shape: f32[8,128], index: 7, kind: output, shape index: {2}]   ;;  %s1113_s8 = inlined_call_operand.hbm [shape: f32[8,128], index: 8, kind: output, shape index: {3}]  }
   0x1   :  { %15 = vsyncpa [#allocation6], 0 }
   0x2   :  { %16 = vsyncpa [#allocation9], 0 }
   0x3   :  { %17 = vsyncpa [#allocation4], 0 }
   0x4   :  { %18 = vsyncpa [#allocation13], 0 }
   0x5   :  { %19 = vsyncpa [#allocation16], 0  ;;  %s880_s27 = smov [#allocation5]   ;;  %s670_s9 = scalar_lea.hbm %s1106_s1, 256 }
   0x6   :  { %s35_s28 = sshll.u32 %s880_s27, 4  ;;  %p671_p0 = scmp.ne.s32.totalorder %s1106_s1, %s670_s9  ;;  %s36_s28 = int_to_ptr.vmem [resolvable:$true] %s35_s28 }
   0x7   :  { %p674_p1 = scmp.lt.u32.totalorder %s670_s9, %s1106_s1 }
   0x9   :  { %p676_p2 = pnand %p674_p1, %p671_p0 }
   0xb   :  { %679 = shalt.err (!%p676_p2)
}
   0xc   :  { %s680_s14 = scalar_lea.vmem %s36_s28, 256  ;;  %p685_p4 = scmp.lt.s32.totalorder %s36_s28, %s36_s28 }
   0xd   :  { %p681_p3 = scmp.ne.s32.totalorder %s36_s28, %s680_s14  ;;  %p686_p5 = scmp.lt.s32.totalorder %s680_s14, %s680_s14 }
   0xf   :  { %p687_p6 = por %p686_p5, %p685_p4 }
  0x11   :  { %p688_p7 = pnand %p687_p6, %p681_p3 }
  0x13   :  { %691 = shalt.err (!%p688_p7)
}
  0x14   :  { %s881_s15 = smov 128   ;;  %s882_s16 = smov 8  }
  0x15   :  { %41 = dma.hbm_to_vmem [thread:$0]  %s1106_s1, 256, %s36_s28, [#allocation6], %s881_s15, %s881_s15, %s882_s16  }
  0x16   :  { %s883_s19 = smov [#allocation8]   ;;  %s884_s21 = smov [#allocation2]  }
  0x17   :  { %s59_s20 = sshll.u32 %s883_s19, 4  ;;  %s26_s22 = sshll.u32 %s884_s21, 4  ;;  %s60_s20 = int_to_ptr.vmem [resolvable:$true] %s59_s20  ;;  %s27_s22 = int_to_ptr.vmem [resolvable:$true] %s26_s22 }
  0x18   :  { %s692_s25 = scalar_lea.hbm %s1108_s3, 2048 }
  0x19   :  { %p693_p8 = scmp.ne.s32.totalorder %s1108_s3, %s692_s25  ;;  %p696_p9 = scmp.lt.u32.totalorder %s692_s25, %s1108_s3 }
  0x1b   :  { %p698_p10 = pnand %p696_p9, %p693_p8 }
  0x1d   :  { %701 = shalt.err (!%p698_p10)
}
  0x1e   :  { %s702_s1 = scalar_lea.vmem %s60_s20, 2048  ;;  %p707_p12 = scmp.lt.s32.totalorder %s60_s20, %s60_s20 }
  0x1f   :  { %p703_p11 = scmp.ne.s32.totalorder %s60_s20, %s702_s1  ;;  %p708_p13 = scmp.lt.s32.totalorder %s702_s1, %s702_s1 }
  0x21   :  { %p709_p0 = por %p708_p13, %p707_p12 }
  0x23   :  { %p710_p1 = pnand %p709_p0, %p703_p11 }
  0x25   :  { %713 = shalt.err (!%p710_p1)
}
  0x26   :  { %65 = dma.hbm_to_vmem [thread:$0]  %s1108_s3, 2048, %s60_s20, [#allocation9], %s881_s15, %s881_s15, %s882_s16  }
  0x27   :  { %s714_s12 = scalar_lea.hbm %s1105_s0, 128 }
  0x28   :  { %p715_p2 = scmp.ne.s32.totalorder %s1105_s0, %s714_s12  ;;  %p718_p3 = scmp.lt.u32.totalorder %s714_s12, %s1105_s0 }
  0x2a   :  { %p720_p4 = pnand %p718_p3, %p715_p2 }
  0x2c   :  { %723 = shalt.err (!%p720_p4)
}
  0x2d   :  { %s724_s19 = scalar_lea.vmem %s27_s22, 128  ;;  %p729_p6 = scmp.lt.s32.totalorder %s27_s22, %s27_s22 }
  0x2e   :  { %p725_p5 = scmp.ne.s32.totalorder %s27_s22, %s724_s19  ;;  %p730_p7 = scmp.lt.s32.totalorder %s724_s19, %s724_s19 }
  0x30   :  { %p731_p8 = por %p730_p7, %p729_p6 }
  0x32   :  { %p732_p9 = pnand %p731_p8, %p725_p5 }
  0x34   :  { %735 = shalt.err (!%p732_p9)
}
  0x35   :  { %29 = dma.hbm_to_vmem [thread:$0]  %s1105_s0, 128, %s27_s22, [#allocation3]  }
  0x36   :  { %s885_s21 = smov [#allocation7]   ;;  %s886_s24 = smov [#allocation10]  }
  0x37   :  { %s47_s23 = sshll.u32 %s885_s21, 4  ;;  %s71_s25 = sshll.u32 %s886_s24, 4  ;;  %s48_s23 = int_to_ptr.vmem [resolvable:$true] %s47_s23  ;;  %s72_s25 = int_to_ptr.vmem [resolvable:$true] %s71_s25 }
  0x38   :  { %s736_s29 = scalar_lea.hbm %s1107_s2, 2048 }
  0x39   :  { %p737_p10 = scmp.ne.s32.totalorder %s1107_s2, %s736_s29  ;;  %p740_p11 = scmp.lt.u32.totalorder %s736_s29, %s1107_s2 }
  0x3b   :  { %p742_p12 = pnand %p740_p11, %p737_p10 }
  0x3d   :  { %745 = shalt.err (!%p742_p12)
}
  0x3e   :  { %s746_s0 = scalar_lea.vmem %s48_s23, 2048  ;;  %p751_p0 = scmp.lt.s32.totalorder %s48_s23, %s48_s23 }
  0x3f   :  { %p747_p13 = scmp.ne.s32.totalorder %s48_s23, %s746_s0  ;;  %p752_p1 = scmp.lt.s32.totalorder %s746_s0, %s746_s0 }
  0x41   :  { %p753_p2 = por %p752_p1, %p751_p0 }
  0x43   :  { %p754_p3 = pnand %p753_p2, %p747_p13 }
  0x45   :  { %757 = shalt.err (!%p754_p3)
}
  0x46   :  { %53 = dma.hbm_to_vmem [thread:$0]  %s1107_s2, 2048, %s48_s23, [#allocation6], %s881_s15, %s881_s15, %s882_s16  }
  0x47   :  { %s758_s13 = scalar_lea.hbm %s1109_s4, 256 }
  0x48   :  { %p759_p4 = scmp.ne.s32.totalorder %s1109_s4, %s758_s13  ;;  %p762_p5 = scmp.lt.u32.totalorder %s758_s13, %s1109_s4 }
  0x4a   :  { %p764_p6 = pnand %p762_p5, %p759_p4 }
  0x4c   :  { %767 = shalt.err (!%p764_p6)
}
  0x4d   :  { %s768_s3 = scalar_lea.vmem %s72_s25, 256  ;;  %p773_p8 = scmp.lt.s32.totalorder %s72_s25, %s72_s25 }
  0x4e   :  { %p769_p7 = scmp.ne.s32.totalorder %s72_s25, %s768_s3  ;;  %p774_p9 = scmp.lt.s32.totalorder %s768_s3, %s768_s3 }
  0x50   :  { %p775_p10 = por %p774_p9, %p773_p8 }
  0x52   :  { %p776_p11 = pnand %p775_p10, %p769_p7 }
  0x54   :  { %779 = shalt.err (!%p776_p11)
}
  0x55   :  { %77 = dma.hbm_to_vmem [thread:$0]  %s1109_s4, 256, %s72_s25, [#allocation9], %s881_s15, %s881_s15, %s882_s16  }
  0x56   :  { %868 = dma.done.wait [#allocation3], 128  }
  0x57   :  { %869 = vsyncadd [#allocation3], 4294967168 }
  0x58   :  { %870 = dma.done.wait [#allocation6], 2304  }
  0x59   :  { %871 = vsyncadd [#allocation6], 4294964992 }
  0x5a   :  { %872 = dma.done.wait [#allocation9], 2304  }
  0x5b   :  { %873 = vsyncadd [#allocation9], 4294964992  ;;  %v887_v0 = vmov 0.0|0.0   ;;  %vm888_vm0 = vmmov 0   ;;  %v889_v1 = vmov 0.0   ;;  %v94_v2 = vld [vmem:[#allocation5] sm:$0xff] }
  0x5c   :  { %602 = vmatprep.subr.bf16.mxu0 %v887_v0  ;;  %522 = vmatprep.mubr.msk.f32.mxu0 %vm888_vm0, %v889_v1  ;;  %v95_v3 = vld [vmem:[#allocation5 + $0x8] sm:$0xff]  ;;  %v171_v5 = vld [vmem:[#allocation7] sm:$0xff]  ;;  %v172_v6 = vld [vmem:[#allocation7 + $0x8] sm:$0xff]  ;;  %vm96_vm1 = vcmask 130048   ;;  %s890_s4 = smov [#allocation11]  }
  0x5d   :  { %605 = vmatprep.subr.bf16.mxu1 %v887_v0  ;;  %557 = vmatprep.mubr.msk.f32.mxu1 %vm888_vm0, %v889_v1  ;;  %v603_v4 = vpack.c.bf16 %v95_v3, %v94_v2  ;;  %v258_v7 = vld [vmem:[#allocation8] sm:$0xff]  ;;  %v606_v8 = vpack.c.bf16 %v172_v6, %v171_v5  ;;  %v259_v9 = vld [vmem:[#allocation8 + $0x8] sm:$0xff]  ;;  %v173_v10 = vld [vmem:[#allocation7 + $0x10] sm:$0xff]  ;;  %s424_s15 = sshll.u32 %s890_s4, 4  ;;  %s425_s15 = int_to_ptr.vmem [resolvable:$true] %s424_s15 }
  0x5e   :  { %v174_v11 = vld [vmem:[#allocation7 + $0x18] sm:$0xff]  ;;  %v1017_v12 = vld [vmem:[#allocation2] sm:$0xff]  ;;  %v630_v13 = vpack.c.bf16 %v259_v9, %v258_v7  ;;  %v260_v15 = vld [vmem:[#allocation8 + $0x10] sm:$0xff]  ;;  %s780_s16 = scalar_lea.vmem %s425_s15, 128  ;;  %p785_p13 = scmp.lt.s32.totalorder %s425_s15, %s425_s15 }
  0x5f   :  { %604 = vmatpush3.bf16.msra.mxu0 %v603_v4  ;;  %607 = vmatpush3.bf16.msra.mxu1 %v606_v8  ;;  %v609_v14 = vpack.c.bf16 %v174_v11, %v173_v10  ;;  %v261_v16 = vld [vmem:[#allocation8 + $0x18] sm:$0xff]  ;;  %v175_v17 = vld [vmem:[#allocation7 + $0x20] sm:$0xff]  ;;  %v176_v18 = vld [vmem:[#allocation7 + $0x28] sm:$0xff]  ;;  %p781_p12 = scmp.ne.s32.totalorder %s425_s15, %s780_s16  ;;  %p786_p0 = scmp.lt.s32.totalorder %s780_s16, %s780_s16 }
  0x60   :  { %629 = vmatprep.subr.bf16.mxu0 %v887_v0  ;;  %608 = vmatprep.subr.bf16.mxu1 %v887_v0  ;;  %v633_v19 = vpack.c.bf16 %v261_v16, %v260_v15  ;;  %v612_v20 = vpack.c.bf16 %v176_v18, %v175_v17  ;;  %v262_v21 = vld [vmem:[#allocation8 + $0x20] sm:$0xff]  ;;  %v263_v22 = vld [vmem:[#allocation8 + $0x28] sm:$0xff]  ;;  %v177_v23 = vld [vmem:[#allocation7 + $0x30] sm:$0xff] }
  0x61   :  { %v178_v24 = vld [vmem:[#allocation7 + $0x38] sm:$0xff]  ;;  %v636_v25 = vpack.c.bf16 %v263_v22, %v262_v21  ;;  %v264_v27 = vld [vmem:[#allocation8 + $0x30] sm:$0xff]  ;;  %v179_v29 = vld [vmem:[#allocation7 + $0x40] sm:$0xff]  ;;  %p787_p1 = por %p786_p0, %p785_p13 }
  0x62   :  { %523 = vmatmul.mubr.msk.f32.vlgmr.msra.gmra.mrb[0].mxu0 %vm96_vm1, %v1017_v12  ;;  %v615_v26 = vpack.c.bf16 %v178_v24, %v177_v23  ;;  %v265_v28 = vld [vmem:[#allocation8 + $0x38] sm:$0xff]  ;;  %v180_v30 = vld [vmem:[#allocation7 + $0x48] sm:$0xff]  ;;  %v266_v33 = vld [vmem:[#allocation8 + $0x40] sm:$0xff] }
  0x63   :  { %631 = vmatpush3.bf16.msra.mxu0 %v630_v13  ;;  %592 = vmatprep.mubr.msk.f32.mxu0 %vm888_vm0, %v889_v1  ;;  %v639_v31 = vpack.c.bf16 %v265_v28, %v264_v27  ;;  %v618_v32 = vpack.c.bf16 %v180_v30, %v179_v29  ;;  %v267_v34 = vld [vmem:[#allocation8 + $0x48] sm:$0xff]  ;;  %v181_v35 = vld [vmem:[#allocation7 + $0x50] sm:$0xff]  ;;  %v182_v36 = vld [vmem:[#allocation7 + $0x58] sm:$0xff]  ;;  %p788_p2 = pnand %p787_p1, %p781_p12 }
  0x64   :  { %610 = vmatpush3.bf16.msra.mxu1 %v609_v14  ;;  %632 = vmatprep.subr.bf16.mxu0 %v887_v0  ;;  %v642_v37 = vpack.c.bf16 %v267_v34, %v266_v33  ;;  %v621_v38 = vpack.c.bf16 %v182_v36, %v181_v35  ;;  %v268_v39 = vld [vmem:[#allocation8 + $0x50] sm:$0xff]  ;;  %v269_v40 = vld [vmem:[#allocation8 + $0x58] sm:$0xff]  ;;  %v183_v41 = vld [vmem:[#allocation7 + $0x60] sm:$0xff] }
  0x65   :  { %611 = vmatprep.subr.bf16.mxu1 %v887_v0  ;;  %v184_v42 = vld [vmem:[#allocation7 + $0x68] sm:$0xff]  ;;  %v645_v43 = vpack.c.bf16 %v269_v40, %v268_v39  ;;  %v270_v45 = vld [vmem:[#allocation8 + $0x60] sm:$0xff]  ;;  %v185_v47 = vld [vmem:[#allocation7 + $0x70] sm:$0xff] }
  0x66   :  { %v624_v44 = vpack.c.bf16 %v184_v42, %v183_v41  ;;  %v271_v46 = vld [vmem:[#allocation8 + $0x68] sm:$0xff]  ;;  %v186_v48 = vld [vmem:[#allocation7 + $0x78] sm:$0xff]  ;;  %v272_v51 = vld [vmem:[#allocation8 + $0x70] sm:$0xff] }
  0x67   :  { %634 = vmatpush3.bf16.msra.mxu0 %v633_v19  ;;  %v648_v49 = vpack.c.bf16 %v271_v46, %v270_v45  ;;  %v627_v50 = vpack.c.bf16 %v186_v48, %v185_v47  ;;  %v273_v52 = vld [vmem:[#allocation8 + $0x78] sm:$0xff]  ;;  %v345_v54 = vld [vmem:[#allocation10] sm:$0xff]  ;;  %v346_v55 = vld [vmem:[#allocation10 + $0x8] sm:$0xff] }
  0x68   :  { %613 = vmatpush3.bf16.msra.mxu1 %v612_v20  ;;  %635 = vmatprep.subr.bf16.mxu0 %v887_v0  ;;  %v651_v53 = vpack.c.bf16 %v273_v52, %v272_v51  ;;  %v654_v56 = vpack.c.bf16 %v346_v55, %v345_v54 }
  0x69   :  { %614 = vmatprep.subr.bf16.mxu1 %v887_v0 }
  0x6b   :  { %637 = vmatpush3.bf16.msra.mxu0 %v636_v25 }
  0x6c   :  { %616 = vmatpush3.bf16.msra.mxu1 %v615_v26  ;;  %638 = vmatprep.subr.bf16.mxu0 %v887_v0 }
  0x6d   :  { %617 = vmatprep.subr.bf16.mxu1 %v887_v0 }
  0x6f   :  { %640 = vmatpush3.bf16.msra.mxu0 %v639_v31 }
  0x70   :  { %619 = vmatpush3.bf16.msra.mxu1 %v618_v32  ;;  %641 = vmatprep.subr.bf16.mxu0 %v887_v0 }
  0x71   :  { %620 = vmatprep.subr.bf16.mxu1 %v887_v0 }
  0x73   :  { %643 = vmatpush3.bf16.msra.mxu0 %v642_v37 }
  0x74   :  { %622 = vmatpush3.bf16.msra.mxu1 %v621_v38  ;;  %644 = vmatprep.subr.bf16.mxu0 %v887_v0 }
  0x75   :  { %623 = vmatprep.subr.bf16.mxu1 %v887_v0 }
  0x77   :  { %646 = vmatpush3.bf16.msra.mxu0 %v645_v43 }
  0x78   :  { %625 = vmatpush3.bf16.msra.mxu1 %v624_v44  ;;  %647 = vmatprep.subr.bf16.mxu0 %v887_v0 }
  0x79   :  { %626 = vmatprep.subr.bf16.mxu1 %v887_v0 }
  0x7b   :  { %649 = vmatpush3.bf16.msra.mxu0 %v648_v49 }
  0x7c   :  { %628 = vmatpush3.bf16.msra.mxu1 %v627_v50  ;;  %650 = vmatprep.subr.bf16.mxu0 %v887_v0 }
  0x7d   :  { %653 = vmatprep.subr.bf16.mxu1 %v887_v0 }
  0x7f   :  { %652 = vmatpush3.bf16.msra.mxu0 %v651_v53 }
 0x135   :  { %v166_v57 = vpop.f32.mrb[0].mxu0 }
 0x136   :  { %170 = vst [vmem:[#allocation11] sm:$0xff] %v166_v57  ;;  %v524_v58 = vpop.f32.mrb[1].mxu0  ;;  %558 = vmatmul.mubr.f32.vlgmr.msra.gmra.mrb[0].mxu1 %v166_v57  ;;  %593 = vmatmul.mubr.f32.vlgmr.msra.gmra.mrb[2].mxu0 %v166_v57 }
 0x137   :  { %655 = vmatpush3.bf16.msra.mxu1 %v654_v56  ;;  %599 = vmatprep.mubr.msk.f32.mxu1 %vm888_vm0, %v889_v1 }
 0x13a   :  { %600 = vmatmul.mubr.msk.f32.vlgmr.msra.gmra.mrb[2].mxu1 %vm96_vm1, %v1017_v12 }
 0x13b   :  { %791 = shalt.err (!%p788_p2)
}
 0x13c   :  { %s792_s24 = scalar_lea.hbm %s1110_s5, 128 }
 0x13d   :  { %p793_p3 = scmp.ne.s32.totalorder %s1110_s5, %s792_s24  ;;  %p796_p4 = scmp.lt.u32.totalorder %s792_s24, %s1110_s5 }
 0x13f   :  { %p798_p5 = pnand %p796_p4, %p793_p3 }
 0x141   :  { %801 = shalt.err (!%p798_p5)
}
 0x142   :  { %427 = dma.vmem_to_hbm [thread:$0]  %s425_s15, 128, %s1110_s5, [#allocation4]  }
 0x143   :  { %s891_s28 = smov [#allocation12]   ;;  %s892_s0 = smov [#allocation14]  }
 0x144   :  { %s434_s9 = sshll.u32 %s891_s28, 4  ;;  %s444_s22 = sshll.u32 %s892_s0, 4  ;;  %s435_s9 = int_to_ptr.vmem [resolvable:$true] %s434_s9  ;;  %s1055_s22 = int_to_ptr.vmem [resolvable:$true] %s444_s22 }
 0x145   :  { %s893_s10 = smov [#allocation15]   ;;  %s802_s12 = scalar_lea.vmem %s435_s9, 128 }
 0x146   :  { %s454_s11 = sshll.u32 %s893_s10, 4  ;;  %p803_p6 = scmp.ne.s32.totalorder %s435_s9, %s802_s12  ;;  %s1057_s11 = int_to_ptr.vmem [resolvable:$true] %s454_s11 }
 0x147   :  { %p807_p7 = scmp.lt.s32.totalorder %s435_s9, %s435_s9  ;;  %p808_p8 = scmp.lt.s32.totalorder %s802_s12, %s802_s12 }
 0x149   :  { %p809_p9 = por %p808_p8, %p807_p7 }
 0x14b   :  { %p810_p10 = pnand %p809_p9, %p803_p6 }
 0x209   :  { %v253_v59 = vpop.f32.mrb[0].mxu1  ;;  %v340_v60 = vpop.f32.mrb[2].mxu0 }
 0x20a   :  { %257 = vst [vmem:[#allocation12] sm:$0xff] %v253_v59  ;;  %344 = vst [vmem:[#allocation14] sm:$0xff] %v340_v60  ;;  %v559_v61 = vpop.f32.mrb[1].mxu1  ;;  %v594_v62 = vpop.f32.mrb[3].mxu0 }
 0x20b   :  { %813 = shalt.err (!%p810_p10)
}
 0x20c   :  { %s814_s14 = scalar_lea.hbm %s1111_s6, 128 }
 0x20d   :  { %p815_p11 = scmp.ne.s32.totalorder %s1111_s6, %s814_s14  ;;  %p818_p12 = scmp.lt.u32.totalorder %s814_s14, %s1111_s6 }
 0x20f   :  { %p820_p13 = pnand %p818_p12, %p815_p11 }
 0x211   :  { %823 = shalt.err (!%p820_p13)
}
 0x212   :  { %437 = dma.vmem_to_hbm [thread:$0]  %s435_s9, 128, %s1111_s6, [#allocation13]  }
 0x213   :  { %s824_s4 = scalar_lea.vmem %s1055_s22, 128  ;;  %p829_p1 = scmp.lt.s32.totalorder %s1055_s22, %s1055_s22 }
 0x214   :  { %p825_p0 = scmp.ne.s32.totalorder %s1055_s22, %s824_s4  ;;  %p830_p2 = scmp.lt.s32.totalorder %s824_s4, %s824_s4 }
 0x216   :  { %p831_p3 = por %p830_p2, %p829_p1 }
 0x218   :  { %p832_p4 = pnand %p831_p3, %p825_p0 }
 0x21a   :  { %835 = shalt.err (!%p832_p4)
}
 0x21b   :  { %s836_s21 = scalar_lea.hbm %s1112_s7, 128 }
 0x21c   :  { %p837_p5 = scmp.ne.s32.totalorder %s1112_s7, %s836_s21  ;;  %p840_p6 = scmp.lt.u32.totalorder %s836_s21, %s1112_s7 }
 0x21e   :  { %p842_p7 = pnand %p840_p6, %p837_p5 }
 0x220   :  { %845 = shalt.err (!%p842_p7)
}
 0x221   :  { %447 = dma.vmem_to_hbm [thread:$0]  %s1055_s22, 128, %s1112_s7, [#allocation13]   ;;  %v413_v63 = vpop.f32.mrb[2].mxu1 }
 0x222   :  { %417 = vst [vmem:[#allocation15] sm:$0xff] %v413_v63  ;;  %v601_v0 = vpop.f32.mrb[3].mxu1  ;;  %s846_s29 = scalar_lea.vmem %s1057_s11, 128  ;;  %p851_p9 = scmp.lt.s32.totalorder %s1057_s11, %s1057_s11 }
 0x223   :  { %p847_p8 = scmp.ne.s32.totalorder %s1057_s11, %s846_s29  ;;  %p852_p10 = scmp.lt.s32.totalorder %s846_s29, %s846_s29 }
 0x225   :  { %p853_p11 = por %p852_p10, %p851_p9 }
 0x227   :  { %p854_p12 = pnand %p853_p11, %p847_p8 }
 0x229   :  { %857 = shalt.err (!%p854_p12)
}
 0x22a   :  { %s858_s28 = scalar_lea.hbm %s1113_s8, 128 }
 0x22b   :  { %p859_p13 = scmp.ne.s32.totalorder %s1113_s8, %s858_s28  ;;  %p862_p0 = scmp.lt.u32.totalorder %s858_s28, %s1113_s8 }
 0x22d   :  { %p864_p1 = pnand %p862_p0, %p859_p13 }
 0x22f   :  { %867 = shalt.err (!%p864_p1)
}
 0x230   :  { %457 = dma.vmem_to_hbm [thread:$0]  %s1057_s11, 128, %s1113_s8, [#allocation16]  }
 0x231   :  { %874 = dma.done.wait [#allocation4], 128  }
 0x232   :  { %875 = vsyncadd [#allocation4], 4294967168 }
 0x233   :  { %876 = dma.done.wait [#allocation13], 256  }
 0x234   :  { %877 = vsyncadd [#allocation13], 4294967040 }
 0x235   :  { %878 = dma.done.wait [#allocation16], 128  }
 0x236   :  { %879 = vsyncadd [#allocation16], 4294967168 }
 0x237   :  { %470 = vsyncpa [#allocation3], 1 }
 0x238   :  { %471 = vsyncpa [#allocation6], 1 }
 0x239   :  { %472 = vsyncpa [#allocation9], 1 }
 0x23a   :  { %473 = vsyncpa [#allocation4], 1 }
 0x23b   :  { %474 = vsyncpa [#allocation13], 1 }
 0x23c   :  { %475 = vsyncpa [#allocation16], 1 }

</bundles_post_ra>
